<compile_context>
chip_gen: v5e
topology: v5e:2x2
jax: 0.10.0
libtpu: 0.0.40
codegen_flags: <defaults>
</compile_context>

<pallas_src>
import math
import functools

import jax
import jax.numpy as jnp
from jax.experimental import pallas as pl
from jax.experimental.pallas import tpu as pltpu


def _round_up(a, b):
    return ((a + b - 1) // b) * b


def _inv_l2_norm(v):
    # torch F.normalize(dim=1, eps=1e-12):  v / max(||v||, 1e-12)
    ss = jnp.sum(v * v, axis=-1, keepdims=True)
    return jax.lax.rsqrt(jnp.maximum(ss, 1e-24))


def _make_cosine_kernel():
    """label is None path: cosine = normalize(x) @ normalize(W).T (per tile)."""

    def kernel(x_ref, wn_ref, out_ref):
        x = x_ref[...].astype(jnp.float32)            # (TB, D) f32
        wn = wn_ref[...]                              # (TC, D) bf16 (pre-normalized)
        xn = (x * _inv_l2_norm(x)).astype(jnp.bfloat16)
        out_ref[...] = jax.lax.dot_general(
            xn, wn,
            dimension_numbers=(((1,), (1,)), ((), ())),
            preferred_element_type=jnp.float32)       # (TB, TC) f32

    return kernel


def _make_arcface_kernel(s, cos_m, sin_m, th, mm, ls_eps, easy_margin,
                         out_features, tile_c):
    """Full ArcMarginProduct2 forward for one (B-tile, C-tile)."""

    def kernel(x_ref, wn_ref, label_ref, out_ref):
        x = x_ref[...].astype(jnp.float32)            # (TB, D) f32
        wn = wn_ref[...]                              # (TC, D) bf16 (pre-normalized)
        lbl = label_ref[...]                          # (TB, 1) int32

        # normalize x: rsqrt + mul (EUP + VPU), then bf16 for the MXU.
        xn = (x * _inv_l2_norm(x)).astype(jnp.bfloat16)

        # cosine = xn @ wn.T without materializing a transpose (contract D).
        cosine = jax.lax.dot_general(
            xn, wn,
            dimension_numbers=(((1,), (1,)), ((), ())),
            preferred_element_type=jnp.float32)       # (TB, TC) f32

        # clamp before sqrt: |cosine| can exceed 1 by a few ULPs after matmul.
        sine = jnp.sqrt(jnp.clip(1.0 - cosine * cosine, 0.0, 1.0))
        phi = cosine * cos_m - sine * sin_m
        if easy_margin:
            phi = jnp.where(cosine > 0.0, phi, cosine)
        else:
            phi = jnp.where(cosine > th, phi, cosine - mm)

        # one-hot select, offset by this C-tile's column base.
        col0 = pl.program_id(1) * tile_c
        col_ids = col0 + jax.lax.broadcasted_iota(jnp.int32, cosine.shape, 1)
        is_target = col_ids == lbl                    # (TB, TC) bool

        if ls_eps > 0.0:
            one_hot = ((1.0 - ls_eps) * is_target.astype(jnp.float32)
                       + ls_eps / float(out_features))
            out_ref[...] = (one_hot * phi + (1.0 - one_hot) * cosine) * s
        else:
            # single select + single scale on the output tile.
            out_ref[...] = jnp.where(is_target, phi, cosine) * s

    return kernel


class ArcMarginProduct2Pallas:
    def __init__(self, in_features, out_features, s=30.0, m=0.5,
                 easy_margin=False, ls_eps=0.0, *, key=None,
                 tile_b=128, tile_c=512):
        self.in_features = in_features
        self.out_features = out_features
        self.s = float(s)
        self.m = float(m)
        self.ls_eps = float(ls_eps)
        self.easy_margin = bool(easy_margin)
        self.cos_m = math.cos(m)
        self.sin_m = math.sin(m)
        self.th = math.cos(math.pi - m)
        self.mm = math.sin(math.pi - m) * m

        # Tile sizes: lane-aligned C tiles (multiple of 128), sublane-aligned B
        # tiles (multiple of 8).  Kept modest so double-buffered W tiles fit the
        # smaller 64 MiB VMEM on v7x as well as v5e/v6e.
        self.max_tb = int(tile_b)
        self.tile_c = min(int(tile_c), _round_up(out_features, 128))
        self.c_pad = _round_up(out_features, self.tile_c)

        # Deterministic xavier_uniform_: U(-a, a), a = sqrt(6/(fan_in+fan_out))
        if key is None:
            key = jax.random.PRNGKey(0)
        bound = math.sqrt(6.0 / (in_features + out_features))
        self.W = jax.random.uniform(
            key, (out_features, in_features), dtype=jnp.float32,
            minval=-bound, maxval=bound)

        # Pre-normalize W once (it is a fixed parameter), pad the class axis to
        # the C tile, store in bf16 for the MXU / halved HBM traffic.
        wn = self.W * _inv_l2_norm(self.W)
        if self.c_pad > out_features:
            wn = jnp.pad(wn, ((0, self.c_pad - out_features), (0, 0)))
        self.Wn_bf16 = wn.astype(jnp.bfloat16)

    def _grid_and_pad(self, B):
        tb = min(self.max_tb, _round_up(B, 8))
        b_pad = _round_up(B, tb)
        grid = (b_pad // tb, self.c_pad // self.tile_c)
        return tb, b_pad, grid

    def __call__(self, x, label=None):
        B, D = x.shape
        assert D == self.in_features
        tb, b_pad, grid = self._grid_and_pad(B)
        tc = self.tile_c

        x_f32 = x.astype(jnp.float32)
        if b_pad > B:
            x_f32 = jnp.pad(x_f32, ((0, b_pad - B), (0, 0)))

        compiler_params = pltpu.CompilerParams(
            dimension_semantics=("parallel", "parallel"))

        if label is None:
            out = pl.pallas_call(
                _make_cosine_kernel(),
                out_shape=jax.ShapeDtypeStruct((b_pad, self.c_pad), jnp.float32),
                grid_spec=pl.GridSpec(
                    grid=grid,
                    in_specs=[
                        pl.BlockSpec((tb, D), lambda i, j: (i, 0)),    # x
                        pl.BlockSpec((tc, D), lambda i, j: (j, 0)),    # Wn
                    ],
                    out_specs=pl.BlockSpec((tb, tc), lambda i, j: (i, j)),
                ),
                compiler_params=compiler_params,
            )(x_f32, self.Wn_bf16)
            return out[:B, :self.out_features]

        label2d = label.astype(jnp.int32).reshape(B, 1)
        if b_pad > B:
            label2d = jnp.pad(label2d, ((0, b_pad - B), (0, 0)))

        kernel = _make_arcface_kernel(
            self.s, self.cos_m, self.sin_m, self.th, self.mm,
            self.ls_eps, self.easy_margin, self.out_features, tc)

        out = pl.pallas_call(
            kernel,
            out_shape=jax.ShapeDtypeStruct((b_pad, self.c_pad), jnp.float32),
            grid_spec=pl.GridSpec(
                grid=grid,
                in_specs=[
                    pl.BlockSpec((tb, D), lambda i, j: (i, 0)),        # x
                    pl.BlockSpec((tc, D), lambda i, j: (j, 0)),        # Wn (bf16)
                    pl.BlockSpec((tb, 1), lambda i, j: (i, 0)),        # label
                ],
                out_specs=pl.BlockSpec((tb, tc), lambda i, j: (i, j)),
            ),
            compiler_params=compiler_params,
        )(x_f32, self.Wn_bf16, label2d)
        return out[:B, :self.out_features]


# ---------------------------------------------------------------------------
# Pure-JAX reference mirroring the kernel's numerics (bf16 MXU operands,
# f32 accumulation, f32 epilogue) for a tight correctness check.
# ---------------------------------------------------------------------------
def _reference(x, W, label, s, cos_m, sin_m, th, mm, ls_eps, out_features):
    xn = (x * _inv_l2_norm(x)).astype(jnp.bfloat16)
    wn = (W * _inv_l2_norm(W)).astype(jnp.bfloat16)
    cosine = jax.lax.dot_general(
        xn, wn, dimension_numbers=(((1,), (1,)), ((), ())),
        preferred_element_type=jnp.float32)
    if label is None:
        return cosine
    sine = jnp.sqrt(jnp.clip(1.0 - cosine * cosine, 0.0, 1.0))
    phi = cosine * cos_m - sine * sin_m
    phi = jnp.where(cosine > th, phi, cosine - mm)
    one_hot = jax.nn.one_hot(label, out_features, dtype=jnp.float32)
    if ls_eps > 0:
        one_hot = (1.0 - ls_eps) * one_hot + ls_eps / out_features
    return (one_hot * phi + (1.0 - one_hot) * cosine) * s


if __name__ == "__main__":
    B, IN_FEATURES, OUT_FEATURES = 8, 32, 128

    key = jax.random.PRNGKey(0)
    kx, kw, kl = jax.random.split(key, 3)

    x = jax.random.normal(kx, (B, IN_FEATURES), dtype=jnp.float32)
    label = jax.random.randint(kl, (B,), 0, OUT_FEATURES, dtype=jnp.int32)

    head = ArcMarginProduct2Pallas(IN_FEATURES, OUT_FEATURES, s=30.0, m=0.5,
                                   easy_margin=False, ls_eps=0.0, key=kw)

    out = jax.block_until_ready(head(x, label))
    assert out.shape == (B, OUT_FEATURES)

    ref = _reference(x, head.W, label, head.s, head.cos_m, head.sin_m,
                     head.th, head.mm, head.ls_eps, OUT_FEATURES)
    assert jnp.allclose(out, ref, atol=1e-2, rtol=1e-2), "mismatch vs reference"

    # label=None path returns plain cosine similarities.
    cos_out = jax.block_until_ready(head(x, None))
    cos_ref = _reference(x, head.W, None, head.s, head.cos_m, head.sin_m,
                         head.th, head.mm, head.ls_eps, OUT_FEATURES)
    assert cos_out.shape == (B, OUT_FEATURES)
    assert jnp.allclose(cos_out, cos_ref, atol=1e-2, rtol=1e-2)

    print("KERNEL_OK")
</pallas_src>

<mosaic_0001>
module attributes {stable_mosaic.version = 11 : i64} {
  func.func @kernel(%arg0: i32, %arg1: i32, %arg2: memref<8x32xf32, #tpu.memory_space<vmem>>, %arg3: memref<128x32xbf16, #tpu.memory_space<vmem>>, %arg4: memref<8x1xi32, #tpu.memory_space<vmem>>, %arg5: memref<8x128xf32, #tpu.memory_space<vmem>>) attributes {dimension_semantics = [#tpu.dimension_semantics<parallel>, #tpu.dimension_semantics<parallel>], iteration_bounds = array<i64: 1, 1>, scalar_prefetch = 0 : i64, scratch_operands = 0 : i64, tpu.core_type = #tpu.core_type<tc>, window_params = [{transform_indices = @transform_0, window_bounds = array<i64: 8, 32>}, {transform_indices = @transform_1, window_bounds = array<i64: 128, 32>}, {transform_indices = @transform_2, window_bounds = array<i64: 8, 1>}, {transform_indices = @transform_3, window_bounds = array<i64: 8, 128>}]} {
    %c0 = arith.constant 0 : index
    %c0_0 = arith.constant 0 : index
    %0 = vector.load %arg2[%c0, %c0_0] : memref<8x32xf32, #tpu.memory_space<vmem>>, vector<8x32xf32>
    %c0_1 = arith.constant 0 : index
    %c0_2 = arith.constant 0 : index
    %1 = vector.load %arg3[%c0_1, %c0_2] : memref<128x32xbf16, #tpu.memory_space<vmem>>, vector<128x32xbf16>
    %c0_3 = arith.constant 0 : index
    %c0_4 = arith.constant 0 : index
    %2 = vector.load %arg4[%c0_3, %c0_4] : memref<8x1xi32, #tpu.memory_space<vmem>>, vector<8x1xi32>
    %3 = arith.mulf %0, %0 : vector<8x32xf32>
    %cst = arith.constant dense<0.000000e+00> : vector<8xf32>
    %4 = vector.multi_reduction <add>, %3, %cst [1] : vector<8x32xf32> to vector<8xf32>
    %5 = vector.shape_cast %4 : vector<8xf32> to vector<8x1xf32>
    %cst_5 = arith.constant 1.000000e-24 : f32
    %6 = vector.broadcast %cst_5 : f32 to vector<8x1xf32>
    %7 = arith.maximumf %5, %6 : vector<8x1xf32>
    %8 = math.rsqrt %7 : vector<8x1xf32>
    %9 = vector.broadcast %8 : vector<8x1xf32> to vector<8x32xf32>
    %10 = arith.mulf %0, %9 : vector<8x32xf32>
    %11 = arith.truncf %10 : vector<8x32xf32> to vector<8x32xbf16>
    %cst_6 = arith.constant dense<0.000000e+00> : vector<8x128xf32>
    %12 = tpu.matmul %11, %1, %cst_6 {dimension_numbers = #tpu.dot_dimension_numbers<[1], [1], [0], [0], [0, 0, 1, 0], [], []>} : vector<8x32xbf16>, vector<128x32xbf16>, vector<8x128xf32> -> vector<8x128xf32>
    %13 = arith.mulf %12, %12 : vector<8x128xf32>
    %cst_7 = arith.constant 1.000000e+00 : f32
    %14 = vector.broadcast %cst_7 : f32 to vector<8x128xf32>
    %15 = arith.subf %14, %13 : vector<8x128xf32>
    %cst_8 = arith.constant 0.000000e+00 : f32
    %cst_9 = arith.constant 1.000000e+00 : f32
    %16 = vector.broadcast %cst_8 : f32 to vector<8x128xf32>
    %17 = arith.maximumf %16, %15 : vector<8x128xf32>
    %18 = vector.broadcast %cst_9 : f32 to vector<8x128xf32>
    %19 = arith.minimumf %18, %17 : vector<8x128xf32>
    %20 = math.sqrt %19 : vector<8x128xf32>
    %cst_10 = arith.constant 0.87758255 : f32
    %21 = vector.broadcast %cst_10 : f32 to vector<8x128xf32>
    %22 = arith.mulf %12, %21 : vector<8x128xf32>
    %cst_11 = arith.constant 0.47942555 : f32
    %23 = vector.broadcast %cst_11 : f32 to vector<8x128xf32>
    %24 = arith.mulf %20, %23 : vector<8x128xf32>
    %25 = arith.subf %22, %24 : vector<8x128xf32>
    %cst_12 = arith.constant -0.87758255 : f32
    %26 = vector.broadcast %cst_12 : f32 to vector<8x128xf32>
    %27 = arith.cmpf ogt, %12, %26 : vector<8x128xf32>
    %cst_13 = arith.constant 0.239712775 : f32
    %28 = vector.broadcast %cst_13 : f32 to vector<8x128xf32>
    %29 = arith.subf %12, %28 : vector<8x128xf32>
    %30 = arith.select %27, %25, %29 : vector<8x128xi1>, vector<8x128xf32>
    %c128_i32 = arith.constant 128 : i32
    %31 = arith.muli %arg1, %c128_i32 : i32
    %32 = tpu.iota {dimensions = array<i32: 1>} : vector<8x128xi32>
    %33 = vector.broadcast %31 : i32 to vector<8x128xi32>
    %34 = arith.addi %33, %32 : vector<8x128xi32>
    %35 = vector.broadcast %2 : vector<8x1xi32> to vector<8x128xi32>
    %36 = arith.cmpi eq, %34, %35 : vector<8x128xi32>
    %37 = arith.select %36, %30, %12 : vector<8x128xi1>, vector<8x128xf32>
    %cst_14 = arith.constant 3.000000e+01 : f32
    %38 = vector.broadcast %cst_14 : f32 to vector<8x128xf32>
    %39 = arith.mulf %37, %38 : vector<8x128xf32>
    %c0_15 = arith.constant 0 : index
    %c0_16 = arith.constant 0 : index
    %40 = vector.load %arg5[%c0_15, %c0_16] : memref<8x128xf32, #tpu.memory_space<vmem>>, vector<8x128xf32>
    tpu.vector_store %arg5[%c0_15, %c0_16], %39 {strides = array<i32>} : memref<8x128xf32, #tpu.memory_space<vmem>>, vector<8x128xf32>,
    return
  }
  func.func @transform_0(%arg0: i32, %arg1: i32) -> (i32, i32) {
    %c0_i32 = arith.constant 0 : i32
    %c0_i32_0 = arith.constant 0 : i32
    return %arg0, %c0_i32 : i32, i32
  }
  func.func @transform_1(%arg0: i32, %arg1: i32) -> (i32, i32) {
    %c0_i32 = arith.constant 0 : i32
    %c0_i32_0 = arith.constant 0 : i32
    return %arg1, %c0_i32 : i32, i32
  }
  func.func @transform_2(%arg0: i32, %arg1: i32) -> (i32, i32) {
    %c0_i32 = arith.constant 0 : i32
    %c0_i32_0 = arith.constant 0 : i32
    return %arg0, %c0_i32 : i32, i32
  }
  func.func @transform_3(%arg0: i32, %arg1: i32) -> (i32, i32) {
    %c0_i32 = arith.constant 0 : i32
    return %arg0, %arg1 : i32, i32
  }
}

</mosaic_0001>

<bundles_post_ra>
// kernel: tpu_custom_call.1
= control target key start
LH: loop header
LB: loop body
LE: loop exit
PB: predicated region body
PF: predicated region fallthrough
CT: control target
= control target key end

     0   :  { %vm34_vm0 = vcmask 261120   ;;  %s321_s0 = inlined_call_operand.vmem [shape: f32[8,32], index: 0, kind: input, shape index: {}]   ;;  %s322_s1 = inlined_call_operand.vmem [shape: bf16[128,32], index: 1, kind: input, shape index: {}]   ;;  %s323_s2 = inlined_call_operand.vmem [shape: s32[8,1], index: 2, kind: input, shape index: {}]   ;;  %s324_s3 = inlined_call_operand.hbm [shape: f32[8,128], index: 3, kind: output, shape index: {}]  }
   0x1   :  { %v15_v0 = vld [vmem:[%s321_s0] sm:$0xff]  ;;  %v222_v1 = vld [vmem:[%s322_s1 + $0x38] sm:$0xff] }
   0x2   :  { %v33_v2 = vmul.f32 %v15_v0, %v15_v0  ;;  %v116_v3 = vsel %vm34_vm0, %v222_v1, 0 }
   0x3   :  { %8 = vsyncpa [#allocation3], 0  ;;  %118 = vmatpush.bf16.xpose.msra.mxu0 %v116_v3  ;;  %v221_v5 = vld [vmem:[%s322_s1 + $0x30] sm:$0xff]  ;;  %v220_v7 = vld [vmem:[%s322_s1 + $0x28] sm:$0xff]  ;;  %v256_v20 = vmov 0   ;;  %v154_v44 = vlaneseq  ;;  %s172_s6 = sshll.u32 %s324_s3, 4  ;;  %s173_s6 = int_to_ptr.hbm [resolvable:$true] %s172_s6 }
   0x4   :  { %v35_v4 = vsel %vm34_vm0, %v33_v2, 0.0  ;;  %v113_v6 = vsel %vm34_vm0, %v221_v5, 0  ;;  %v110_v8 = vsel %vm34_vm0, %v220_v7, 0  ;;  %v219_v9 = vld [vmem:[%s322_s1 + $0x20] sm:$0xff]  ;;  %v218_v11 = vld [vmem:[%s322_s1 + $0x18] sm:$0xff]  ;;  %v217_v13 = vld [vmem:[%s322_s1 + $0x10] sm:$0xff]  ;;  %225 = vset.pattern.permute.xlu0 %v256_v20 }
   0x5   :  { %36 = vadd.xlane.f32.xlu0 %v35_v4  ;;  %v107_v10 = vsel %vm34_vm0, %v219_v9, 0  ;;  %v104_v12 = vsel %vm34_vm0, %v218_v11, 0  ;;  %v101_v14 = vsel %vm34_vm0, %v217_v13, 0  ;;  %v216_v15 = vld [vmem:[%s322_s1 + $0x8] sm:$0xff]  ;;  %v215_v17 = vld [vmem:[%s322_s1] sm:$0xff]  ;;  %v155_v48 = vand.u32 127, %v154_v44 }
   0x6   :  { %v98_v16 = vsel %vm34_vm0, %v216_v15, 0  ;;  %v95_v18 = vsel %vm34_vm0, %v215_v17, 0  ;;  %v32_v19 = vld [vmem:[%s323_s2] sm:$0xff]  ;;  %s257_s1 = smov [#allocation2]  }
   0x7   :  { %s170_s2 = sshll.u32 %s257_s1, 4  ;;  %s171_s2 = int_to_ptr.vmem [resolvable:$true] %s170_s2 }
   0xb   :  { %119 = vmatpush.bf16.xpose.msra.mxu0 %v113_v6 }
  0x13   :  { %120 = vmatpush.bf16.xpose.msra.mxu0 %v110_v8 }
  0x19   :  { %159 = vperm.xlu0 %225, %v32_v19  }
  0x1b   :  { %121 = vmatpush.bf16.xpose.msra.mxu0 %v107_v10 }
  0x23   :  { %122 = vmatpush.bf16.xpose.msra.mxu0 %v104_v12 }
  0x2b   :  { %123 = vmatpush.bf16.xpose.msra.mxu0 %v101_v14 }
  0x33   :  { %124 = vmatpush.bf16.xpose.msra.mxu0 %v98_v16 }
  0x3b   :  { %125 = vmatpush.bf16.xpose.msra.mxu0 %v95_v18 }
  0x78   :  { %v37_v21 = vpop.xlane.xlu0 %36 }
  0x79   :  { %v38_v22 = vmax.f32 %v37_v21, 1e-24 }
  0x7b   :  { %226 = vrsqrt.f32 %v38_v22  ;;  %vm45_vm2 = vweird.f32 %v38_v22 }
  0x81   :  { %v227_v23 = vpop.eup %226 }
  0x82   :  { %v40_v24 = vmul.f32 %v227_v23, %v38_v22  ;;  %vm46_vm1 = vweird.f32 %v227_v23 }
  0x83   :  { %vm47_vm3 = vmor %vm45_vm2, %vm46_vm1 }
  0x84   :  { %v41_v25 = vmul.f32 %v227_v23, %v40_v24 }
  0x86   :  { %v42_v26 = vmul.f32 0.5, %v41_v25 }
  0x88   :  { %v43_v27 = vsub.f32 1.5, %v42_v26 }
  0x8a   :  { %v44_v28 = vmul.f32 %v227_v23, %v43_v27 }
  0x8b   :  { %v160_v50 = vpop.permute.xlu0 %159 }
  0x8c   :  { %v48_v29 = vsel %vm47_vm3, %v227_v23, %v44_v28  ;;  %vm161_vm6 = vcmp.eq.s32.totalorder %v155_v48, %v160_v50 }
  0x8d   :  { %v49_v30 = vmul.f32 %v48_v29, %v15_v0 }
  0x8f   :  { %v50_v31 = vpack.c.bf16 %v49_v30, %v49_v30 }
  0x91   :  { %213 = vmatmul.msk.bf16.vlgmr.msra.gmra.mxu0 %vm34_vm0, %v50_v31 }
 0x10e   :  { %v127_v32 = vpop.f32.mrf.mxu0 }
 0x10f   :  { %v131_v33 = vmul.f32 %v127_v32, %v127_v32  ;;  %v147_v51 = vmul.f32 0.87758255, %v127_v32  ;;  %v214_v53 = vadd.f32 -0.23971277, %v127_v32  ;;  %vm150_vm7 = vcmp.gt.f32.partialorder %v127_v32, -0.87758255 }
 0x111   :  { %v132_v34 = vsub.f32 1.0, %v131_v33 }
 0x113   :  { %v133_v35 = vmax.f32 %v132_v34, 0.0 }
 0x115   :  { %v134_v36 = vmin.f32 %v133_v35, 1.0 }
 0x116   :  { %v129_v37 = vpop.f32.mrf.mxu0 }
 0x117   :  { %228 = vrsqrt.f32 %v134_v36  ;;  %vm142_vm4 = vcmp.eq.f32.partialorder %v134_v36, inf  ;;  %v145_v46 = vand.u32 2147483648, %v134_v36  ;;  %vm144_vm5 = vcmp.eq.f32.partialorder %v134_v36, 0.0 }
 0x11d   :  { %v229_v38 = vpop.eup %228 }
 0x11e   :  { %v136_v39 = vmul.f32 %v229_v38, %v134_v36 }
 0x120   :  { %v137_v40 = vmul.f32 %v229_v38, %v136_v39 }
 0x122   :  { %v138_v41 = vmul.f32 0.5, %v137_v40 }
 0x124   :  { %v139_v42 = vsub.f32 1.5, %v138_v41 }
 0x126   :  { %v140_v43 = vmul.f32 %v229_v38, %v139_v42 }
 0x128   :  { %v141_v45 = vmul.f32 %v140_v43, %v134_v36 }
 0x12a   :  { %v143_v47 = vsel %vm142_vm4, %v134_v36, %v141_v45 }
 0x12b   :  { %v146_v49 = vsel %vm144_vm5, %v145_v46, %v143_v47 }
 0x12c   :  { %v148_v52 = vmul.f32 0.47942555, %v146_v49 }
 0x12e   :  { %v149_v54 = vsub.f32 %v147_v51, %v148_v52 }
 0x130   :  { %v152_v55 = vsel %vm150_vm7, %v149_v54, %v214_v53 }
 0x131   :  { %v162_v56 = vsel %vm161_vm6, %v152_v55, %v127_v32 }
 0x132   :  { %v163_v57 = vmul.f32 30.0, %v162_v56 }
 0x134   :  { %164 = vst [vmem:[#allocation2] sm:$0xff] %v163_v57 }
 0x135   :  { %175 = dma.vmem_to_hbm [thread:$0]  %s171_s2, 128, %s173_s6, [#allocation3]  }
 0x136   :  { %254 = dma.done.wait [#allocation3], 128  }
 0x137   :  { %255 = vsyncadd [#allocation3], 4294967168 }
 0x138   :  { %180 = vsyncpa [#allocation3], 1 }

</bundles_post_ra>
